<compile_context>
chip_gen: v5e
topology: v5e:2x2
jax: 0.10.0
libtpu: 0.0.40
codegen_flags: <defaults>
</compile_context>

<pallas_src>
import functools

import jax
import jax.numpy as jnp
from jax import lax
from jax.experimental import pallas as pl
from jax.experimental.pallas import tpu as pltpu

EPS_F = 1e-12


# ---------------------------------------------------------------------------
# Kernel: one pass over Q_S column blocks, fused forward/backward projection.
# ---------------------------------------------------------------------------
def _idm_kernel(y_ref, qs_ref, qf_ref, lf_ref, ls_ref, z_ref, acc_ref, *, gamma):
    k = pl.program_id(0)

    @pl.when(k == 0)
    def _init():
        acc_ref[...] = jnp.zeros_like(acc_ref)

    qs = qs_ref[...]                                                   # (n, TN) column block of Q_S
    # T_k = (Y @ Q_S[:, k]) / (1 - gamma * lf ls_k^T)
    t = jnp.dot(y_ref[...], qs, preferred_element_type=jnp.float32)   # (m, TN) MXU, f32 acc
    denom = 1.0 - gamma * (lf_ref[...] * ls_ref[...])                 # (m, TN) f32, once per tile
    t = (t * pl.reciprocal(denom, approx=False)).astype(qs.dtype)
    # W += T_k @ Q_S[:, k]^T : contract the TN axis of BOTH operands so the
    # MXU consumes Q_S in its stored layout (no XLU transpose, no VMEM temp).
    acc_ref[...] += lax.dot_general(
        t, qs, (((1,), (1,)), ((), ())), preferred_element_type=jnp.float32)

    @pl.when(k == pl.num_programs(0) - 1)
    def _finish():
        # Hoisted small matmul: Z = Q_F @ W, written once (lane-dense store).
        z_ref[...] = jnp.dot(
            qf_ref[...], acc_ref[...], preferred_element_type=jnp.float32
        ).astype(z_ref.dtype)


def _pick_col_tile(n):
    if n % 128 != 0:
        return n  # full-extent block (exempt from the (8,128) divisibility rule)
    for t in (512, 256, 128):
        if n % t == 0 and n // t >= 2:
            return t
    return n


# ---------------------------------------------------------------------------
# Wrapper: eigendecomposition + hoisted small matmuls + tiled pallas_call.
# ---------------------------------------------------------------------------
def idm_forward(X, F, Q_S, Lambda_S, gamma, *, col_tile=None,
                matmul_dtype=jnp.float32):
    """EIGNN_exact_u forward.  X: (m, n) = (feature_dim, num_nodes)."""
    m, n = X.shape
    X = X.astype(jnp.float32)
    F = F.astype(jnp.float32)
    Q_S = Q_S.astype(jnp.float32)

    # eigh(F^T F) has the same eigenvectors as eigh(g(F)); fold the
    # 1/(||F^T F||_F + eps) scale into the eigenvalues instead of the matrix.
    # TODO(synk): eigh has no clean Pallas equivalent; kept as a plain XLA op.
    FF = jnp.dot(F.T, F, precision=lax.Precision.HIGHEST)
    evals, Q_F = jnp.linalg.eigh(FF)
    fro = jnp.sqrt(jnp.sum(evals * evals))            # ||F^T F||_F from eigenvalues
    lf = (evals / (fro + EPS_F)).reshape(m, 1).astype(jnp.float32)
    ls = Lambda_S.reshape(1, n).astype(jnp.float32)

    # Hoisted tiny matmul: Y = Q_F^T X  (only (m,m)x(m,n); stays outside the
    # Q_S-streaming loop).
    Y = jnp.dot(Q_F.T, X, precision=lax.Precision.HIGHEST)

    tn = col_tile if col_tile is not None else _pick_col_tile(n)
    assert n % tn == 0, (n, tn)
    kt = n // tn

    kernel = functools.partial(_idm_kernel, gamma=float(gamma))
    return pl.pallas_call(
        kernel,
        out_shape=jax.ShapeDtypeStruct((m, n), jnp.float32),
        grid=(kt,),
        in_specs=[
            pl.BlockSpec((m, n), lambda k: (0, 0)),   # Y   (VMEM-resident, DMA'd once)
            pl.BlockSpec((n, tn), lambda k: (0, k)),  # Q_S column block (streamed once, double-buffered)
            pl.BlockSpec((m, m), lambda k: (0, 0)),   # Q_F (resident)
            pl.BlockSpec((m, 1), lambda k: (0, 0)),   # Lambda_F column (resident)
            pl.BlockSpec((1, tn), lambda k: (0, k)),  # Lambda_S row block
        ],
        out_specs=pl.BlockSpec((m, n), lambda k: (0, 0)),   # Z resident; written at last step
        scratch_shapes=[pltpu.VMEM((m, n), jnp.float32)],   # W accumulator
        compiler_params=pltpu.CompilerParams(
            dimension_semantics=("arbitrary",),             # axis carries the accumulator
            vmem_limit_bytes=48 * 1024 * 1024,              # headroom on v7x's 64 MiB
        ),
    )(
        Y.astype(matmul_dtype),
        Q_S.astype(matmul_dtype),
        Q_F.astype(jnp.float32),
        lf,
        ls,
    )


if __name__ == "__main__":
    m, n = 32, 512        # m = feature dim (F is m x m), n = number of graph nodes
    gamma = 0.8

    key = jax.random.PRNGKey(0)
    kF, kA, kX = jax.random.split(key, 3)

    # Parameter F: xavier_uniform_ init, shape (m, m).
    bound = (6.0 / (m + m)) ** 0.5
    F = jax.random.uniform(kF, (m, m), jnp.float32, -bound, bound)

    # Synthetic symmetric normalized adjacency S and its eigendecomposition
    # (mirrors what the module's __init__ precomputes with scipy).
    B = jax.random.uniform(kA, (n, n), jnp.float32)
    A = (((B + B.T) * 0.5) > 0.7).astype(jnp.float32)
    A = A + jnp.eye(n, dtype=jnp.float32)
    A = (A + A.T) * 0.5
    dinv = 1.0 / jnp.sqrt(jnp.sum(A, axis=1))
    S = A * dinv[:, None] * dinv[None, :]
    Lambda_S, Q_S = jnp.linalg.eigh(S)

    # Input features X: (m, n) = (feature_dim, num_nodes).
    X = jax.random.normal(kX, (m, n), jnp.float32)

    # f32 path (4 pipelined column tiles of Q_S).
    Z = idm_forward(X, F, Q_S, Lambda_S, gamma, col_tile=128)
    Z = jax.block_until_ready(Z)

    # Pure-JAX reference of the same closed-form forward pass (full precision).
    hp = lax.Precision.HIGHEST
    FF = jnp.dot(F.T, F, precision=hp)
    gF_ref = FF / (jnp.linalg.norm(FF) + EPS_F)
    Lf, Qf = jnp.linalg.eigh(gF_ref)
    D = 1.0 - gamma * Lf[:, None] * Lambda_S[None, :]
    inner = jnp.dot(jnp.dot(Qf.T, X, precision=hp), Q_S, precision=hp) / D
    Z_ref = jnp.dot(jnp.dot(Qf, inner, precision=hp), Q_S.T, precision=hp)

    assert Z.shape == (m, n)
    err = float(jnp.max(jnp.abs(Z - Z_ref)))
    assert jnp.allclose(Z, Z_ref, atol=5e-4, rtol=5e-4), err

    # bf16-operand path (halves HBM traffic of Q_S; f32 MXU accumulation).
    Z16 = jax.block_until_ready(
        idm_forward(X, F, Q_S, Lambda_S, gamma, matmul_dtype=jnp.bfloat16))
    err16 = float(jnp.max(jnp.abs(Z16 - Z_ref)))
    scale = float(jnp.max(jnp.abs(Z_ref))) + 1.0
    assert err16 < 0.1 * scale, (err16, scale)

    print("KERNEL_OK")
</pallas_src>

<mosaic_0001>
module attributes {stable_mosaic.version = 11 : i64} {
  func.func @_idm_kernel(%arg0: i32, %arg1: memref<32x512xf32, #tpu.memory_space<vmem>>, %arg2: memref<512x128xf32, #tpu.memory_space<vmem>>, %arg3: memref<32x32xf32, #tpu.memory_space<vmem>>, %arg4: memref<32x1xf32, #tpu.memory_space<vmem>>, %arg5: memref<1x128xf32, #tpu.memory_space<vmem>>, %arg6: memref<32x512xf32, #tpu.memory_space<vmem>>, %arg7: memref<32x512xf32, #tpu.memory_space<vmem>>) attributes {dimension_semantics = [#tpu.dimension_semantics<arbitrary>], iteration_bounds = array<i64: 4>, scalar_prefetch = 0 : i64, scratch_operands = 1 : i64, tpu.core_type = #tpu.core_type<tc>, window_params = [{pipeline_mode = #tpu.pipeline_mode<synchronous>, transform_indices = @transform_0, window_bounds = array<i64: 32, 512>}, {transform_indices = @transform_1, window_bounds = array<i64: 512, 128>}, {pipeline_mode = #tpu.pipeline_mode<synchronous>, transform_indices = @transform_2, window_bounds = array<i64: 32, 32>}, {pipeline_mode = #tpu.pipeline_mode<synchronous>, transform_indices = @transform_3, window_bounds = array<i64: 32, 1>}, {transform_indices = @transform_4, window_bounds = array<i64: 1, 128>}, {pipeline_mode = #tpu.pipeline_mode<synchronous>, transform_indices = @transform_5, window_bounds = array<i64: 32, 512>}]} {
    %c0_i32 = arith.constant 0 : i32
    %0 = arith.cmpi eq, %arg0, %c0_i32 : i32
    %1 = arith.extui %0 : i1 to i32
    %c0_i32_0 = arith.constant 0 : i32
    %2 = arith.cmpi ne, %1, %c0_i32_0 : i32
    scf.if %2 {
      %cst_16 = arith.constant 0.000000e+00 : f32
      %24 = vector.broadcast %cst_16 : f32 to vector<32x512xf32>
      %c0_17 = arith.constant 0 : index
      %c0_18 = arith.constant 0 : index
      %25 = vector.load %arg7[%c0_17, %c0_18] : memref<32x512xf32, #tpu.memory_space<vmem>>, vector<32x512xf32>
      tpu.vector_store %arg7[%c0_17, %c0_18], %24 {strides = array<i32>} : memref<32x512xf32, #tpu.memory_space<vmem>>, vector<32x512xf32>,
    } else {
    }
    %c0 = arith.constant 0 : index
    %c0_1 = arith.constant 0 : index
    %3 = vector.load %arg2[%c0, %c0_1] : memref<512x128xf32, #tpu.memory_space<vmem>>, vector<512x128xf32>
    %c0_2 = arith.constant 0 : index
    %c0_3 = arith.constant 0 : index
    %4 = vector.load %arg1[%c0_2, %c0_3] : memref<32x512xf32, #tpu.memory_space<vmem>>, vector<32x512xf32>
    %cst = arith.constant dense<0.000000e+00> : vector<32x128xf32>
    %5 = tpu.matmul %4, %3, %cst {dimension_numbers = #tpu.dot_dimension_numbers<[1], [0], [0], [1], [0, 0, 1, 1], [], []>} : vector<32x512xf32>, vector<512x128xf32>, vector<32x128xf32> -> vector<32x128xf32>
    %c0_4 = arith.constant 0 : index
    %c0_5 = arith.constant 0 : index
    %6 = vector.load %arg4[%c0_4, %c0_5] : memref<32x1xf32, #tpu.memory_space<vmem>>, vector<32x1xf32>
    %c0_6 = arith.constant 0 : index
    %c0_7 = arith.constant 0 : index
    %7 = vector.load %arg5[%c0_6, %c0_7] : memref<1x128xf32, #tpu.memory_space<vmem>>, vector<1x128xf32>
    %8 = vector.broadcast %6 : vector<32x1xf32> to vector<32x128xf32>
    %9 = vector.broadcast %7 : vector<1x128xf32> to vector<32x128xf32>
    %10 = arith.mulf %8, %9 : vector<32x128xf32>
    %cst_8 = arith.constant 8.000000e-01 : f32
    %11 = vector.broadcast %cst_8 : f32 to vector<32x128xf32>
    %12 = arith.mulf %11, %10 : vector<32x128xf32>
    %cst_9 = arith.constant 1.000000e+00 : f32
    %13 = vector.broadcast %cst_9 : f32 to vector<32x128xf32>
    %14 = arith.subf %13, %12 : vector<32x128xf32>
    %15 = tpu.reciprocal %14 : vector<32x128xf32> -> vector<32x128xf32>
    %16 = arith.mulf %5, %15 : vector<32x128xf32>
    %c0_10 = arith.constant 0 : index
    %c0_11 = arith.constant 0 : index
    %17 = vector.load %arg7[%c0_10, %c0_11] : memref<32x512xf32, #tpu.memory_space<vmem>>, vector<32x512xf32>
    %cst_12 = arith.constant dense<0.000000e+00> : vector<32x512xf32>
    %18 = tpu.matmul %16, %3, %cst_12 {dimension_numbers = #tpu.dot_dimension_numbers<[1], [1], [0], [0], [0, 0, 1, 0], [], []>} : vector<32x128xf32>, vector<512x128xf32>, vector<32x512xf32> -> vector<32x512xf32>
    %19 = arith.addf %17, %18 : vector<32x512xf32>
    %c0_13 = arith.constant 0 : index
    %c0_14 = arith.constant 0 : index
    %20 = vector.load %arg7[%c0_13, %c0_14] : memref<32x512xf32, #tpu.memory_space<vmem>>, vector<32x512xf32>
    tpu.vector_store %arg7[%c0_13, %c0_14], %19 {strides = array<i32>} : memref<32x512xf32, #tpu.memory_space<vmem>>, vector<32x512xf32>,
    %c3_i32 = arith.constant 3 : i32
    %21 = arith.cmpi eq, %arg0, %c3_i32 : i32
    %22 = arith.extui %21 : i1 to i32
    %c0_i32_15 = arith.constant 0 : i32
    %23 = arith.cmpi ne, %22, %c0_i32_15 : i32
    scf.if %23 {
      %c0_16 = arith.constant 0 : index
      %c0_17 = arith.constant 0 : index
      %24 = vector.load %arg3[%c0_16, %c0_17] : memref<32x32xf32, #tpu.memory_space<vmem>>, vector<32x32xf32>
      %c0_18 = arith.constant 0 : index
      %c0_19 = arith.constant 0 : index
      %25 = vector.load %arg7[%c0_18, %c0_19] : memref<32x512xf32, #tpu.memory_space<vmem>>, vector<32x512xf32>
      %cst_20 = arith.constant dense<0.000000e+00> : vector<32x512xf32>
      %26 = tpu.matmul %24, %25, %cst_20 {dimension_numbers = #tpu.dot_dimension_numbers<[1], [0], [0], [1], [0, 0, 1, 1], [], []>} : vector<32x32xf32>, vector<32x512xf32>, vector<32x512xf32> -> vector<32x512xf32>
      %c0_21 = arith.constant 0 : index
      %c0_22 = arith.constant 0 : index
      %27 = vector.load %arg6[%c0_21, %c0_22] : memref<32x512xf32, #tpu.memory_space<vmem>>, vector<32x512xf32>
      tpu.vector_store %arg6[%c0_21, %c0_22], %26 {strides = array<i32>} : memref<32x512xf32, #tpu.memory_space<vmem>>, vector<32x512xf32>,
    } else {
    }
    return
  }
  func.func @transform_0(%arg0: i32) -> (i32, i32) {
    %c0_i32 = arith.constant 0 : i32
    %c0_i32_0 = arith.constant 0 : i32
    %c0_i32_1 = arith.constant 0 : i32
    return %c0_i32, %c0_i32_0 : i32, i32
  }
  func.func @transform_1(%arg0: i32) -> (i32, i32) {
    %c0_i32 = arith.constant 0 : i32
    %c0_i32_0 = arith.constant 0 : i32
    return %c0_i32, %arg0 : i32, i32
  }
  func.func @transform_2(%arg0: i32) -> (i32, i32) {
    %c0_i32 = arith.constant 0 : i32
    %c0_i32_0 = arith.constant 0 : i32
    %c0_i32_1 = arith.constant 0 : i32
    return %c0_i32, %c0_i32_0 : i32, i32
  }
  func.func @transform_3(%arg0: i32) -> (i32, i32) {
    %c0_i32 = arith.constant 0 : i32
    %c0_i32_0 = arith.constant 0 : i32
    %c0_i32_1 = arith.constant 0 : i32
    return %c0_i32, %c0_i32_0 : i32, i32
  }
  func.func @transform_4(%arg0: i32) -> (i32, i32) {
    %c0_i32 = arith.constant 0 : i32
    %c0_i32_0 = arith.constant 0 : i32
    return %c0_i32, %arg0 : i32, i32
  }
  func.func @transform_5(%arg0: i32) -> (i32, i32) {
    %c0_i32 = arith.constant 0 : i32
    %c0_i32_0 = arith.constant 0 : i32
    %c0_i32_1 = arith.constant 0 : i32
    return %c0_i32, %c0_i32_0 : i32, i32
  }
}

</mosaic_0001>

<bundles_post_ra>
// kernel: tpu_custom_call.1
= control target key start
LH: loop header
LB: loop body
LE: loop exit
PB: predicated region body
PF: predicated region fallthrough
CT: control target
= control target key end

     0   :  { %10 = vsyncpa [#allocation4], 0  ;;  %s1877_s0 = inlined_call_operand.hbm [shape: f32[32,512], index: 0, kind: input, shape index: {}]   ;;  %s1878_s1 = inlined_call_operand.hbm [shape: f32[512,512], index: 1, kind: input, shape index: {}]   ;;  %s1879_s2 = inlined_call_operand.vmem [shape: f32[32,32], index: 2, kind: input, shape index: {}]   ;;  %s1880_s3 = inlined_call_operand.vmem [shape: f32[32,1], index: 3, kind: input, shape index: {}]   ;;  %s1881_s4 = inlined_call_operand.hbm [shape: f32[1,512], index: 4, kind: input, shape index: {}]   ;;  %s1882_s5 = inlined_call_operand.hbm [shape: f32[32,512], index: 5, kind: output, shape index: {}]  }
   0x1   :  { %11 = vsyncpa [#allocation7], 0 }
   0x2   :  { %13 = vsyncpa [#allocation7 + $0x1], 0 }
   0x3   :  { %14 = vsyncpa [#allocation5], 0  ;;  %s1333_s18 = smov 0   ;;  %s1335_s19 = smov 0  }
   0x4   :  { %s1337_s20 = smov 0   ;;  %s1339_s21 = smov 0  }
   0x5 LB: > { %s1354_s22 = sadd.s32 1, %s1291_s21   ;;  %s48_s23 = sadd.s32 1, %s1287_s20  ;;  %s1291_s21 = sphi %s1339_s21, %s1911_s21   ;;  %s1287_s20 = sphi %s1337_s20, %s1910_s20   ;;  %s1283_s19 = sphi %s1335_s19, %s1909_s19   ;;  %s1279_s18 = sphi %s1333_s18, %s1908_s18  }
   0x6   : > { %s45_s24 = ssub.s32 %s1291_s21, %s1354_s22  ;;  %p55_p0 = scmp.ne.s32.totalorder %s1287_s20, %s1283_s19 }
   0x7   : > { %p46_p1 = scmp.eq.s32.totalorder %s45_s24, 0  ;;  %p56_p2 = scmp.eq.s32.totalorder %s1291_s21, 0 }
   0x8   : > { %p1074_p4 = scmp.lt.s32.totalorder %s1291_s21, 4  ;;  %s194_s26 = sand.u32 1, %s1291_s21  }
   0x9   : > { %s1363_s25 = scalar_select %p46_p1, %s1287_s20, %s48_s23  }
   0xa   : > { %p57_p3 = por %p56_p2, %p55_p0  ;;  %s196_s27 = sand.u32 1, %s1287_s20  }
   0xb   : > { %s1023_s28 = sshll.u32 %s196_s27, 9  ;;  %s1024_s29 = sshll.u32 %s1291_s21, 3 }
   0xc   : > { %s202_s7 = scalar_lea.hbm %s1878_s1, %s1024_s29  ;;  %s198_s8 = scalar_lea.vmem [#allocation6], %s1023_s28 }
   0xd   : > { %s205_s9 = sshll.u32 %s198_s8, 4  ;;  %s203_s10 = sshll.u32 %s202_s7, 4  ;;  %s206_s9 = int_to_ptr.vmem [resolvable:$true] %s205_s9  ;;  %s204_s10 = int_to_ptr.hbm [resolvable:$true] %s203_s10 }
   0xe   : > { %p1374_p5 = pnand %p1074_p4, %p57_p3  ;;  %s1378_s12 = scalar_lea.sflag [#allocation7], %s194_s26 }
   0xf   : > { %s1131_s13 = sshra.s32 %s204_s10, 4  ;;  %s1138_s17 = scalar_lea.hbm %s1878_s1, 2048  ;;  %s1132_s13 = int_to_ptr.hbm [resolvable:$true] %s1131_s13 }
  0x10   : > { %s1133_s14 = scalar_lea.hbm %s1132_s13, 512  ;;  %p1135_p7 = pneg %p1374_p5 }
  0x11   : > { %p1134_p6 = scmp.ne.s32.totalorder %s1132_s13, %s1133_s14  ;;  %p1139_p10 = scmp.lt.s32.totalorder %s1132_s13, %s1878_s1 }
  0x12   : > { %p1140_p11 = scmp.lt.s32.totalorder %s1138_s17, %s1133_s14 }
  0x13   : > { %p1136_p8 = pnand %p1135_p7, %p1134_p6 }
  0x14   : > { %p1141_p12 = por %p1140_p11, %p1139_p10 }
  0x15   : > { %p1137_p9 = pneg %p1136_p8 }
  0x17   : > { %p1142_p13 = pnand %p1141_p12, %p1137_p9 }
  0x19   : > { %1145 = shalt.err (!%p1142_p13)
}
  0x1a   : > { %s1293_s26 = smov 512   ;;  %s1294_s28 = smov 128  }
  0x1b   : > { %s1295_s29 = smov 8   ;;  %s1395_s30 = sadd.s32 4294967295, %s1291_s21  }
  0x1c   : > { %1069 = dma.hbm_to_vmem [thread:$0]  (!%p1374_p5), %s204_s10, 8192, %s206_s9, %s1378_s12, %s1293_s26, %s1294_s28, %s1295_s29  }
  0x1d   : > { %p61_p0 = scmp.ne.s32.totalorder %s1283_s19, %s1279_s18  ;;  %p62_p1 = scmp.eq.s32.totalorder %s1395_s30, 0 }
  0x1e   : > { %p1020_p2 = scmp.ge.s32.totalorder %s1291_s21, 1  ;;  %p161_p3 = scmp.lt.s32.totalorder %s1291_s21, 5 }
  0x1f   : > { %p1404_p4 = por %p62_p1, %p61_p0  ;;  %p1021_p6 = scmp.ne.s32.totalorder %s1395_s30, 0 }
  0x20   : > { %p1409_p8 = pnand %p1020_p2, %p161_p3  ;;  %s172_s10 = sshll.u32 %s1877_s0, 4  ;;  %s173_s10 = int_to_ptr.hbm [resolvable:$true] %s172_s10 }
  0x21   : > { %s1296_s18 = smov [#allocation3]   ;;  %s221_s16 = scalar_lea.hbm %s1881_s4, %s1291_s21 }
  0x22   : > { %p1062_p9 = pneg %p1409_p8  ;;  %s174_s13 = sshll.u32 %s1296_s18, 4  ;;  %s175_s13 = int_to_ptr.vmem [resolvable:$true] %s174_s13 }
  0x23   : > { %s218_s17 = scalar_lea.vmem [#allocation8], %s196_s27  ;;  %s223_s24 = sshll.u32 %s221_s16, 4  ;;  %s224_s24 = int_to_ptr.hbm [resolvable:$true] %s223_s24 }
  0x24   : > { %p1063_p10 = pnand %p1062_p9, %p62_p1  ;;  %s225_s23 = sshll.u32 %s218_s17, 4  ;;  %s226_s23 = int_to_ptr.vmem [resolvable:$true] %s225_s23 }
  0x25   : > { %s1297_s28 = smov 32   ;;  %s1191_s29 = sshra.s32 %s224_s24, 4  ;;  %s1192_s29 = int_to_ptr.hbm [resolvable:$true] %s1191_s29 }
  0x26   : > { %1065 = dma.hbm_to_vmem [thread:$0]  (!%p1063_p10), %s173_s10, 2048, %s175_s13, [#allocation4], %s1293_s26, %s1293_s26, %s1297_s28  }
  0x27   : > { %s1193_s8 = scalar_lea.hbm %s1192_s29, 1  ;;  %s1198_s21 = scalar_lea.hbm %s1881_s4, 4 }
  0x28   : > { %p1194_p11 = scmp.ne.s32.totalorder %s1192_s29, %s1193_s8  ;;  %p1199_p0 = scmp.lt.s32.totalorder %s1192_s29, %s1881_s4 }
  0x29   : > { %p1200_p2 = scmp.lt.s32.totalorder %s1198_s21, %s1193_s8 }
  0x2a   : > { %p1196_p12 = pnand %p1194_p11, %p1135_p7 }
  0x2b   : > { %p1201_p3 = por %p1200_p2, %p1199_p0 }
  0x2c   : > { %p1197_p13 = pneg %p1196_p12 }
  0x2e   : > { %p1202_p9 = pnand %p1201_p3, %p1197_p13 }
  0x30   : > { %1205 = shalt.err (!%p1202_p9)
}
  0x31   : > { %1072 = dma.hbm_to_vmem [thread:$0]  (!%p1374_p5), %s224_s24, 16, %s226_s23, %s1378_s12  }
  0x32   : > { %234 = sbr.rel (%p1409_p8) target bundleno = 592 (0x250), region = 40 }
  0x37   : > { %1266 = dma.done.wait (%p62_p1), [#allocation4], 2048  }
  0x38   : > { %1268 = vsyncadd (%p62_p1), [#allocation4], 4294965248  ;;  %s241_s26 = sand.u32 1, %s1395_s30   ;;  %s243_s10 = sand.u32 1, %s1283_s19  }
  0x39   : > { %s1027_s13 = sshll.u32 %s243_s10, 9  ;;  %s242_s15 = scalar_lea.sflag [#allocation7], %s241_s26 }
  0x3a   : > { %s1446_s16 = scalar_lea.vmem [#allocation6], %s1027_s13 }
  0x3b   : > { %1270 = dma.done.wait (%p1404_p4), %s242_s15, 8208  }
  0x3c   : > { %1272 = vsyncadd (%p1404_p4), %s242_s15, 4294959088  ;;  %s1452_s11 = scalar_lea.vmem [#allocation8], %s243_s10  ;;  %284 = sbr.rel (%p1021_p6) target bundleno = 82 (0x52), region = 56 }
  0x41   : > { %v1298_v0 = vmov 0.0  }
  0x42   : > { %285 = vst [vmem:[#allocation2 + $0x30] sm:$0xff] %v1298_v0 }
  0x43   : > { %286 = vst [vmem:[#allocation2] sm:$0xff] %v1298_v0 }
  0x44   : > { %287 = vst [vmem:[#allocation2 + $0x58] sm:$0xff] %v1298_v0 }
  0x45   : > { %288 = vst [vmem:[#allocation2 + $0x18] sm:$0xff] %v1298_v0 }
  0x46   : > { %289 = vst [vmem:[#allocation2 + $0x50] sm:$0xff] %v1298_v0 }
  0x47   : > { %290 = vst [vmem:[#allocation2 + $0x68] sm:$0xff] %v1298_v0 }
  0x48   : > { %291 = vst [vmem:[#allocation2 + $0x8] sm:$0xff] %v1298_v0 }
  0x49   : > { %292 = vst [vmem:[#allocation2 + $0x48] sm:$0xff] %v1298_v0 }
  0x4a   : > { %293 = vst [vmem:[#allocation2 + $0x40] sm:$0xff] %v1298_v0 }
  0x4b   : > { %294 = vst [vmem:[#allocation2 + $0x20] sm:$0xff] %v1298_v0 }
  0x4c   : > { %295 = vst [vmem:[#allocation2 + $0x10] sm:$0xff] %v1298_v0 }
  0x4d   : > { %296 = vst [vmem:[#allocation2 + $0x38] sm:$0xff] %v1298_v0 }
  0x4e   : > { %297 = vst [vmem:[#allocation2 + $0x60] sm:$0xff] %v1298_v0 }
  0x4f   : > { %298 = vst [vmem:[#allocation2 + $0x70] sm:$0xff] %v1298_v0 }
  0x50   : > { %299 = vst [vmem:[#allocation2 + $0x78] sm:$0xff] %v1298_v0 }
  0x51   : > { %300 = vst [vmem:[#allocation2 + $0x28] sm:$0xff] %v1298_v0 }
  0x52 PF: > { %v1457_v1 = vld [vmem:[%s1446_s16 + $0x178] sm:$0xff]  ;;  %v1460_v2 = vld [vmem:[%s1446_s16 + $0x170] sm:$0xff]  ;;  %v1474_v6 = vld [vmem:[%s1446_s16 + $0x168] sm:$0xff]  ;;  %v1299_v16 = vmov 0   ;;  %p1029_p5 = scmp.ne.s32.totalorder %s1395_s30, 3 }
  0x53   : > { %v1463_v3 = vld [vmem:[%s1446_s16 + $0x1f8] sm:$0xff]  ;;  %439 = vmatpush.msra.mxu2 %v1457_v1  ;;  %v1479_v7 = vld [vmem:[%s1446_s16 + $0x1f0] sm:$0xff]  ;;  %v1490_v10 = vld [vmem:[%s1446_s16 + $0x1e8] sm:$0xff]  ;;  %1120 = vset.pattern.permute.xlu0 %v1299_v16 }
  0x54   : > { %468 = vmatpush.msra.mxu3 %v1463_v3  ;;  %v1468_v4 = vld [vmem:[%s1446_s16 + $0x78] sm:$0xff]  ;;  %v1482_v8 = vld [vmem:[%s1446_s16 + $0x70] sm:$0xff]  ;;  %v1495_v11 = vld [vmem:[%s1446_s16 + $0x160] sm:$0xff]  ;;  %1121 = vset.pattern.permute.xlu1 %v1299_v16 }
  0x55   : > { %v1471_v5 = vld [vmem:[%s1446_s16 + $0xf8] sm:$0xff]  ;;  %381 = vmatpush.msra.mxu0 %v1468_v4  ;;  %v1485_v9 = vld [vmem:[%s1446_s16 + $0xf0] sm:$0xff]  ;;  %440 = vmatpush.msra.mxu2 %v1460_v2  ;;  %v497_v12 = vld [vmem:[%s1880_s3] sm:$0xff] }
  0x56   : > { %410 = vmatpush.msra.mxu1 %v1471_v5  ;;  %469 = vmatpush.msra.mxu3 %v1479_v7  ;;  %v1501_v13 = vld [vmem:[%s1446_s16 + $0x68] sm:$0xff]  ;;  %v1509_v15 = vld [vmem:[%s1446_s16 + $0x1e0] sm:$0xff]  ;;  %v1514_v17 = vld [vmem:[%s1446_s16 + $0x158] sm:$0xff] }
  0x57   : > { %382 = vmatpush.msra.mxu0 %v1482_v8  ;;  %441 = vmatpush.msra.mxu2 %v1474_v6  ;;  %v1506_v14 = vld [vmem:[%s1446_s16 + $0xe8] sm:$0xff]  ;;  %v1517_v18 = vld [vmem:[%s1446_s16 + $0x60] sm:$0xff]  ;;  %v1524_v20 = vld [vmem:[%s1446_s16 + $0x1d8] sm:$0xff] }
  0x58   : > { %411 = vmatpush.msra.mxu1 %v1485_v9  ;;  %470 = vmatpush.msra.mxu3 %v1490_v10  ;;  %v1521_v19 = vld [vmem:[%s1446_s16 + $0xe0] sm:$0xff]  ;;  %v1529_v21 = vld [vmem:[%s1446_s16 + $0x150] sm:$0xff]  ;;  %v1532_v22 = vld [vmem:[%s1446_s16 + $0x58] sm:$0xff] }
  0x59   : > { %383 = vmatpush.msra.mxu0 %v1501_v13  ;;  %442 = vmatpush.msra.mxu2 %v1495_v11  ;;  %v1537_v23 = vld [vmem:[%s1446_s16 + $0xd8] sm:$0xff]  ;;  %v1540_v24 = vld [vmem:[%s1446_s16 + $0x1d0] sm:$0xff]  ;;  %v1545_v25 = vld [vmem:[%s1446_s16 + $0x148] sm:$0xff] }
  0x5a   : > { %504 = vperm.xlu0 %1120, %v497_v12   ;;  %412 = vmatpush.msra.mxu1 %v1506_v14  ;;  %v1548_v26 = vld [vmem:[%s1446_s16 + $0x50] sm:$0xff]  ;;  %v1556_v28 = vld [vmem:[%s1446_s16 + $0x1c8] sm:$0xff]  ;;  %v1561_v29 = vld [vmem:[%s1446_s16 + $0x140] sm:$0xff] }
  0x5b   : > { %471 = vmatpush.msra.mxu3 %v1509_v15  ;;  %443 = vmatpush.msra.mxu2 %v1514_v17  ;;  %v1553_v27 = vld [vmem:[%s1446_s16 + $0xd0] sm:$0xff]  ;;  %v498_v30 = vld [vmem:[%s1880_s3 + $0x8] sm:$0xff]  ;;  %v1577_v33 = vld [vmem:[%s1446_s16 + $0x138] sm:$0xff] }
  0x5c   : > { %384 = vmatpush.msra.mxu0 %v1517_v18  ;;  %413 = vmatpush.msra.mxu1 %v1521_v19  ;;  %v1569_v31 = vld [vmem:[%s1446_s16 + $0x48] sm:$0xff]  ;;  %v1580_v34 = vld [vmem:[%s1446_s16 + $0x1c0] sm:$0xff]  ;;  %v1592_v37 = vld [vmem:[%s1446_s16 + $0x130] sm:$0xff] }
  0x5d   : > { %472 = vmatpush.msra.mxu3 %v1524_v20  ;;  %444 = vmatpush.msra.mxu2 %v1529_v21  ;;  %v1572_v32 = vld [vmem:[%s1446_s16 + $0xc8] sm:$0xff]  ;;  %v1584_v35 = vld [vmem:[%s1446_s16 + $0x40] sm:$0xff]  ;;  %v1595_v38 = vld [vmem:[%s1446_s16 + $0x1b8] sm:$0xff] }
  0x5e   : > { %385 = vmatpush.msra.mxu0 %v1532_v22  ;;  %414 = vmatpush.msra.mxu1 %v1537_v23  ;;  %v1587_v36 = vld [vmem:[%s1446_s16 + $0xc0] sm:$0xff]  ;;  %v1600_v39 = vld [vmem:[%s1446_s16 + $0x38] sm:$0xff]  ;;  %v1608_v41 = vld [vmem:[%s1446_s16 + $0x128] sm:$0xff] }
  0x5f   : > { %473 = vmatpush.msra.mxu3 %v1540_v24  ;;  %445 = vmatpush.msra.mxu2 %v1545_v25  ;;  %v1603_v40 = vld [vmem:[%s1446_s16 + $0xb8] sm:$0xff]  ;;  %v1611_v42 = vld [vmem:[%s1446_s16 + $0x1b0] sm:$0xff]  ;;  %v1624_v45 = vld [vmem:[%s1446_s16 + $0x120] sm:$0xff] }
  0x60   : > { %386 = vmatpush.msra.mxu0 %v1548_v26  ;;  %415 = vmatpush.msra.mxu1 %v1553_v27  ;;  %v1616_v43 = vld [vmem:[%s1446_s16 + $0x30] sm:$0xff]  ;;  %v1627_v46 = vld [vmem:[%s1446_s16 + $0x1a8] sm:$0xff]  ;;  %v1645_v50 = vld [vmem:[%s1446_s16 + $0x118] sm:$0xff] }
  0x61   : > { %474 = vmatpush.msra.mxu3 %v1556_v28  ;;  %446 = vmatpush.msra.mxu2 %v1561_v29  ;;  %v1619_v44 = vld [vmem:[%s1446_s16 + $0xb0] sm:$0xff]  ;;  %v1632_v47 = vld [vmem:[%s1446_s16 + $0x28] sm:$0xff]  ;;  %v1648_v51 = vld [vmem:[%s1446_s16 + $0x1a0] sm:$0xff] }
  0x62   : > { %509 = vperm.xlu0 %1120, %v498_v30   ;;  %387 = vmatpush.msra.mxu0 %v1569_v31  ;;  %v499_v48 = vld [vmem:[%s1880_s3 + $0x10] sm:$0xff]  ;;  %v1640_v49 = vld [vmem:[%s1446_s16 + $0xa8] sm:$0xff]  ;;  %v1653_v52 = vld [vmem:[%s1446_s16 + $0x20] sm:$0xff] }
  0x63   : > { %416 = vmatpush.msra.mxu1 %v1572_v32  ;;  %447 = vmatpush.msra.mxu2 %v1577_v33  ;;  %v1656_v53 = vld [vmem:[%s1446_s16 + $0xa0] sm:$0xff]  ;;  %v1660_v54 = vld [vmem:[%s1446_s16 + $0x110] sm:$0xff]  ;;  %v1663_v55 = vld [vmem:[%s1446_s16 + $0x198] sm:$0xff] }
  0x64   : > { %475 = vmatpush.msra.mxu3 %v1580_v34  ;;  %388 = vmatpush.msra.mxu0 %v1584_v35  ;;  %1892 = vst [vmem:[#allocation13_spill] sm:$0xff] %v1660_v54  ;;  %v1668_v56 = vld [vmem:[%s1446_s16 + $0x18] sm:$0xff]  ;;  %v1676_v58 = vld [vmem:[%s1446_s16 + $0x108] sm:$0xff]  ;;  %v1679_v59 = vld [vmem:[%s1446_s16 + $0x190] sm:$0xff] }
  0x65   : > { %417 = vmatpush.msra.mxu1 %v1587_v36  ;;  %448 = vmatpush.msra.mxu2 %v1592_v37  ;;  %v1671_v57 = vld [vmem:[%s1446_s16 + $0x98] sm:$0xff]  ;;  %1893 = vst [vmem:[#allocation14_spill] sm:$0xff] %v1676_v58  ;;  %v1684_v60 = vld [vmem:[%s1446_s16 + $0x10] sm:$0xff]  ;;  %v1692_v62 = vld [vmem:[%s1446_s16 + $0x100] sm:$0xff] }
  0x66   : > { %476 = vmatpush.msra.mxu3 %v1595_v38  ;;  %389 = vmatpush.msra.mxu0 %v1600_v39  ;;  %1894 = vst [vmem:[#allocation15_spill] sm:$0xff] %v1679_v59  ;;  %v1687_v61 = vld [vmem:[%s1446_s16 + $0x90] sm:$0xff]  ;;  %v1695_v63 = vld [vmem:[%s1446_s16 + $0x188] sm:$0xff]  ;;  %v500_v12 = vld [vmem:[%s1880_s3 + $0x18] sm:$0xff] }
  0x67   : > { %418 = vmatpush.msra.mxu1 %v1603_v40  ;;  %449 = vmatpush.msra.mxu2 %v1608_v41  ;;  %1895 = vst [vmem:[#allocation16_spill] sm:$0xff] %v1684_v60  ;;  %v367_v0 = vld [vmem:[#allocation3 + $0x10] sm:$0xff]  ;;  %v1705_v16 = vld [vmem:[%s1446_s16 + $0x8] sm:$0xff] }
  0x68   : > { %477 = vmatpush.msra.mxu3 %v1611_v42  ;;  %390 = vmatpush.msra.mxu0 %v1616_v43  ;;  %1896 = vst [vmem:[#allocation17_spill] sm:$0xff] %v1687_v61  ;;  %v1708_v30 = vld [vmem:[%s1446_s16 + $0x88] sm:$0xff] }
  0x69   : > { %419 = vmatpush.msra.mxu1 %v1619_v44  ;;  %450 = vmatpush.msra.mxu2 %v1624_v45 }
  0x6a   : > { %478 = vmatpush.msra.mxu3 %v1627_v46  ;;  %391 = vmatpush.msra.mxu0 %v1632_v47 }
  0x6b   : > { %514 = vperm.xlu1 %1121, %v499_v48   ;;  %420 = vmatpush.msra.mxu1 %v1640_v49  ;;  %v1713_v48 = vld [vmem:[%s1446_s16 + $0x180] sm:$0xff] }
  0x6c   : > { %451 = vmatpush.msra.mxu2 %v1645_v50  ;;  %479 = vmatpush.msra.mxu3 %v1648_v51  ;;  %1897 = vst [vmem:[#allocation18_spill] sm:$0xff] %v1713_v48 }
  0x6d   : > { %392 = vmatpush.msra.mxu0 %v1653_v52  ;;  %421 = vmatpush.msra.mxu1 %v1656_v53 }
  0x6e   : > { %452 = vmatpush.msra.mxu2 %v1660_v54  ;;  %480 = vmatpush.msra.mxu3 %v1663_v55  ;;  %v366_v54 = vld [vmem:[#allocation3 + $0x8] sm:$0xff] }
  0x6f   : > { %393 = vmatpush.msra.mxu0 %v1668_v56  ;;  %422 = vmatpush.msra.mxu1 %v1671_v57 }
  0x70   : > { %453 = vmatpush.msra.mxu2 %v1676_v58  ;;  %481 = vmatpush.msra.mxu3 %v1679_v59  ;;  %v368_v58 = vld [vmem:[#allocation3 + $0x18] sm:$0xff]  ;;  %v1716_v59 = vld [vmem:[%s1446_s16] sm:$0xff] }
  0x71   : > { %394 = vmatpush.msra.mxu0 %v1684_v60  ;;  %423 = vmatpush.msra.mxu1 %v1687_v61  ;;  %v1721_v61 = vld [vmem:[%s1446_s16 + $0x80] sm:$0xff] }
  0x72   : > { %454 = vmatpush.msra.mxu2 %v1692_v62  ;;  %482 = vmatpush.msra.mxu3 %v1695_v63  ;;  %v365_v60 = vld [vmem:[#allocation3] sm:$0xff] }
  0x73   : > { %455 = vmatmul.f32.vlgmr.msra.gmra.mxu2 %v367_v0  ;;  %519 = vperm.xlu1 %1121, %v500_v12   ;;  %v371_v0 = vld [vmem:[#allocation3 + $0x30] sm:$0xff]  ;;  %v372_v12 = vld [vmem:[#allocation3 + $0x38] sm:$0xff] }
  0x74   : > { %395 = vmatpush.msra.mxu0 %v1705_v16  ;;  %424 = vmatpush.msra.mxu1 %v1708_v30 }
  0x75   : > { %483 = vmatpush.msra.mxu3 %v1713_v48  ;;  %671 = vmatpush.xpose.msrb.mxu2 %v1457_v1  ;;  %v369_v48 = vld [vmem:[#allocation3 + $0x20] sm:$0xff]  ;;  %v370_v1 = vld [vmem:[#allocation3 + $0x28] sm:$0xff] }
  0x76   : > { %484 = vmatmul.f32.vlgmr.msra.gmra.mxu3 %v368_v58  ;;  %396 = vmatpush.msra.mxu0 %v1716_v59 }
  0x77   : > { %425 = vmatpush.msra.mxu1 %v1721_v61  ;;  %397 = vmatmul.f32.vlgmr.msra.gmra.mxu0 %v365_v60 }
  0x78   : > { %426 = vmatmul.f32.vlgmr.msra.gmra.mxu1 %v366_v54  ;;  %613 = vmatpush.xpose.msrb.mxu0 %v1468_v4  ;;  %v375_v4 = vld [vmem:[#allocation3 + $0x50] sm:$0xff] }
  0x79   : > { %642 = vmatpush.xpose.msrb.mxu1 %v1471_v5  ;;  %700 = vmatpush.xpose.msrb.mxu3 %v1463_v3  ;;  %v373_v3 = vld [vmem:[#allocation3 + $0x40] sm:$0xff]  ;;  %v374_v5 = vld [vmem:[#allocation3 + $0x48] sm:$0xff] }
  0x7a   : > { %672 = vmatpush.xpose.msrb.mxu2 %v1460_v2  ;;  %v376_v2 = vld [vmem:[#allocation3 + $0x58] sm:$0xff] }
  0x7b   : > { %458 = vmatmul.f32.gmra.mxu2 %v371_v0 }
  0x7c   : > { %614 = vmatpush.xpose.msrb.mxu0 %v1482_v8  ;;  %v377_v8 = vld [vmem:[#allocation3 + $0x60] sm:$0xff] }
  0x7d   : > { %643 = vmatpush.xpose.msrb.mxu1 %v1485_v9  ;;  %701 = vmatpush.xpose.msrb.mxu3 %v1479_v7  ;;  %v380_v7 = vld [vmem:[#allocation3 + $0x78] sm:$0xff]  ;;  %v378_v9 = vld [vmem:[#allocation3 + $0x68] sm:$0xff] }
  0x7e   : > { %487 = vmatmul.f32.gmra.mxu3 %v372_v12  ;;  %673 = vmatpush.xpose.msrb.mxu2 %v1474_v6  ;;  %v379_v6 = vld [vmem:[#allocation3 + $0x70] sm:$0xff]  ;;  %v606_v12 = vld [vmem:[#allocation2 + $0x20] sm:$0xff] }
  0x7f   : > { %400 = vmatmul.f32.gmra.mxu0 %v369_v48 }
  0x80   : > { %429 = vmatmul.f32.gmra.mxu1 %v370_v1  ;;  %615 = vmatpush.xpose.msrb.mxu0 %v1501_v13  ;;  %v1900_v13 = vld [vmem:[#allocation17_spill] sm:$0xff] }
  0x81   : > { %644 = vmatpush.xpose.msrb.mxu1 %v1506_v14  ;;  %702 = vmatpush.xpose.msrb.mxu3 %v1490_v10  ;;  %v1898_v10 = vld [vmem:[#allocation13_spill] sm:$0xff]  ;;  %v1901_v14 = vld [vmem:[#allocation15_spill] sm:$0xff] }
  0x82   : > { %674 = vmatpush.xpose.msrb.mxu2 %v1495_v11  ;;  %v1899_v11 = vld [vmem:[#allocation16_spill] sm:$0xff] }
  0x83   : > { %461 = vmatmul.f32.gmra.mxu2 %v375_v4 }
  0x84   : > { %616 = vmatpush.xpose.msrb.mxu0 %v1517_v18 }
  0x85   : > { %645 = vmatpush.xpose.msrb.mxu1 %v1521_v19  ;;  %703 = vmatpush.xpose.msrb.mxu3 %v1509_v15  ;;  %v1902_v15 = vld [vmem:[#allocation14_spill] sm:$0xff]  ;;  %v1122_v19 = vld [vmem:[%s1452_s11] ss:$0 sm:$0xff] }
  0x86   : > { %490 = vmatmul.f32.gmra.mxu3 %v376_v2  ;;  %675 = vmatpush.xpose.msrb.mxu2 %v1514_v17  ;;  %v1903_v17 = vld [vmem:[#allocation18_spill] sm:$0xff] }
  0x87   : > { %403 = vmatmul.f32.gmra.mxu0 %v373_v3 }
  0x88   : > { %432 = vmatmul.f32.gmra.mxu1 %v374_v5  ;;  %617 = vmatpush.xpose.msrb.mxu0 %v1532_v22 }
  0x89   : > { %646 = vmatpush.xpose.msrb.mxu1 %v1537_v23  ;;  %704 = vmatpush.xpose.msrb.mxu3 %v1524_v20 }
  0x8a   : > { %676 = vmatpush.xpose.msrb.mxu2 %v1529_v21 }
  0x8b   : > { %464 = vmatmul.f32.gmra.mxu2 %v379_v6 }
  0x8c   : > { %618 = vmatpush.xpose.msrb.mxu0 %v1548_v26 }
  0x8d   : > { %647 = vmatpush.xpose.msrb.mxu1 %v1553_v27  ;;  %705 = vmatpush.xpose.msrb.mxu3 %v1540_v24 }
  0x8e   : > { %493 = vmatmul.f32.gmra.mxu3 %v380_v7  ;;  %677 = vmatpush.xpose.msrb.mxu2 %v1545_v25 }
  0x8f   : > { %406 = vmatmul.f32.gmra.mxu0 %v377_v8 }
  0x90   : > { %435 = vmatmul.f32.gmra.mxu1 %v378_v9  ;;  %619 = vmatpush.xpose.msrb.mxu0 %v1569_v31 }
  0x91   : > { %648 = vmatpush.xpose.msrb.mxu1 %v1572_v32  ;;  %706 = vmatpush.xpose.msrb.mxu3 %v1556_v28 }
  0x92   : > { %678 = vmatpush.xpose.msrb.mxu2 %v1561_v29 }
  0x94   : > { %620 = vmatpush.xpose.msrb.mxu0 %v1584_v35 }
  0x95   : > { %649 = vmatpush.xpose.msrb.mxu1 %v1587_v36  ;;  %707 = vmatpush.xpose.msrb.mxu3 %v1580_v34 }
  0x96   : > { %679 = vmatpush.xpose.msrb.mxu2 %v1577_v33 }
  0x98   : > { %621 = vmatpush.xpose.msrb.mxu0 %v1600_v39 }
  0x99   : > { %650 = vmatpush.xpose.msrb.mxu1 %v1603_v40  ;;  %708 = vmatpush.xpose.msrb.mxu3 %v1595_v38 }
  0x9a   : > { %680 = vmatpush.xpose.msrb.mxu2 %v1592_v37 }
  0x9c   : > { %622 = vmatpush.xpose.msrb.mxu0 %v1616_v43 }
  0x9d   : > { %651 = vmatpush.xpose.msrb.mxu1 %v1619_v44  ;;  %709 = vmatpush.xpose.msrb.mxu3 %v1611_v42 }
  0x9e   : > { %681 = vmatpush.xpose.msrb.mxu2 %v1608_v41 }
  0xa0   : > { %623 = vmatpush.xpose.msrb.mxu0 %v1632_v47 }
  0xa1   : > { %652 = vmatpush.xpose.msrb.mxu1 %v1640_v49  ;;  %710 = vmatpush.xpose.msrb.mxu3 %v1627_v46 }
  0xa2   : > { %682 = vmatpush.xpose.msrb.mxu2 %v1624_v45 }
  0xa4   : > { %624 = vmatpush.xpose.msrb.mxu0 %v1653_v52 }
  0xa5   : > { %653 = vmatpush.xpose.msrb.mxu1 %v1656_v53  ;;  %711 = vmatpush.xpose.msrb.mxu3 %v1648_v51 }
  0xa6   : > { %683 = vmatpush.xpose.msrb.mxu2 %v1645_v50 }
  0xa8   : > { %625 = vmatpush.xpose.msrb.mxu0 %v1668_v56 }
  0xa9   : > { %654 = vmatpush.xpose.msrb.mxu1 %v1671_v57  ;;  %712 = vmatpush.xpose.msrb.mxu3 %v1663_v55 }
  0xaa   : > { %684 = vmatpush.xpose.msrb.mxu2 %v1898_v10 }
  0xac   : > { %626 = vmatpush.xpose.msrb.mxu0 %v1899_v11 }
  0xad   : > { %655 = vmatpush.xpose.msrb.mxu1 %v1900_v13  ;;  %713 = vmatpush.xpose.msrb.mxu3 %v1901_v14 }
  0xae   : > { %685 = vmatpush.xpose.msrb.mxu2 %v1902_v15 }
  0xb0   : > { %627 = vmatpush.xpose.msrb.mxu0 %v1705_v16 }
  0xb1   : > { %656 = vmatpush.xpose.msrb.mxu1 %v1708_v30  ;;  %714 = vmatpush.xpose.msrb.mxu3 %v1695_v63 }
  0xb2   : > { %686 = vmatpush.xpose.msrb.mxu2 %v1692_v62 }
  0xb4   : > { %628 = vmatpush.xpose.msrb.mxu0 %v1716_v59 }
  0xb5   : > { %657 = vmatpush.xpose.msrb.mxu1 %v1721_v61  ;;  %715 = vmatpush.xpose.msrb.mxu3 %v1903_v17 }
  0xcc   : > { %v505_v18 = vpop.permute.xlu0 %504 }
  0xcd   : > { %v525_v20 = vmul.f32 %v1122_v19, %v505_v18 }
  0xcf   : > { %v529_v21 = vmul.f32 0.8, %v525_v20 }
  0xd1   : > { %v533_v23 = vsub.f32 1.0, %v529_v21 }
  0xd3   : > { %1123 = vrcp.f32 %v533_v23  ;;  %vm542_vm0 = vweird.f32 %v533_v23  ;;  %v546_v42 = vand.u32 2147483647, %v533_v23  ;;  %v548_v43 = vand.u32 2147483648, %v533_v23 }
  0xd4   : > { %v510_v22 = vpop.permute.xlu0 %509 }
  0xd5   : > { %v526_v24 = vmul.f32 %v1122_v19, %v510_v22  ;;  %vm547_vm3 = vcmp.eq.f32.partialorder %v546_v42, 8.507059e+37  ;;  %v549_v52 = vor.u32 1.1754944e-38, %v548_v43 }
  0xd7   : > { %v530_v26 = vmul.f32 0.8, %v526_v24 }
  0xd9   : > { %v534_v27 = vsub.f32 1.0, %v530_v26  ;;  %v1124_v29 = vpop.eup %1123 }
  0xda   : > { %v538_v32 = vmul.f32 %v1124_v29, %v533_v23  ;;  %vm543_vm1 = vweird.f32 %v1124_v29 }
  0xdb   : > { %1125 = vrcp.f32 %v534_v27  ;;  %vm544_vm2 = vmor %vm542_vm0, %vm543_vm1  ;;  %vm556_vm4 = vweird.f32 %v534_v27  ;;  %v560_v60 = vand.u32 2147483647, %v534_v27  ;;  %v562_v61 = vand.u32 2147483648, %v534_v27 }
  0xdc   : > { %v539_v36 = vsub.f32 1.0, %v538_v32 }
  0xdd   : > { %v515_v25 = vpop.permute.xlu1 %514  ;;  %vm561_vm7 = vcmp.eq.f32.partialorder %v560_v60, 8.507059e+37  ;;  %v563_v2 = vor.u32 1.1754944e-38, %v562_v61 }
  0xde   : > { %v527_v28 = vmul.f32 %v1122_v19, %v515_v25  ;;  %v540_v40 = vmul.f32 %v1124_v29, %v539_v36 }
  0xe0   : > { %v531_v31 = vmul.f32 0.8, %v527_v28  ;;  %v541_v45 = vadd.f32 %v1124_v29, %v540_v40 }
  0xe1   : > { %v1126_v37 = vpop.eup %1125 }
  0xe2   : > { %v1791_v34 = vsub.f32 1.0, %v531_v31  ;;  %v552_v39 = vmul.f32 %v1126_v37, %v534_v27  ;;  %v545_v55 = vsel %vm544_vm2, %v1124_v29, %v541_v45  ;;  %vm557_vm5 = vweird.f32 %v1126_v37 }
  0xe3   : > { %v550_v59 = vsel %vm547_vm3, %v549_v52, %v545_v55  ;;  %vm1803_vm6 = vmor %vm556_vm4, %vm557_vm5  ;;  %v601_v55 = vld [vmem:[#allocation2 + $0x50] sm:$0xff] }
  0xe4   : > { %1127 = vrcp.f32 %v1791_v34  ;;  %v553_v46 = vsub.f32 1.0, %v552_v39  ;;  %vm570_vm8 = vweird.f32 %v1791_v34  ;;  %v576_v11 = vand.u32 2147483648, %v1791_v34 }
  0xe5   : > { %v520_v33 = vpop.permute.xlu1 %519  ;;  %v574_v17 = vand.u32 2147483647, %v1791_v34 }
  0xe6   : > { %v528_v35 = vmul.f32 %v1122_v19, %v520_v33  ;;  %v554_v56 = vmul.f32 %v1126_v37, %v553_v46  ;;  %v577_v23 = vor.u32 1.1754944e-38, %v576_v11  ;;  %v609_v11 = vld [vmem:[#allocation2 + $0x60] sm:$0xff] }
  0xe7   : > { %vm575_vm11 = vcmp.eq.f32.partialorder %v574_v17, 8.507059e+37 }
  0xe8   : > { %v532_v38 = vmul.f32 0.8, %v528_v35  ;;  %v555_v16 = vadd.f32 %v1126_v37, %v554_v56  ;;  %v602_v56 = vld [vmem:[#allocation2 + $0x68] sm:$0xff] }
  0xea   : > { %v1794_v41 = vsub.f32 1.0, %v532_v38  ;;  %v1796_v47 = vpop.eup %1127  ;;  %v559_v6 = vsel %vm1803_vm6, %v1126_v37, %v555_v16 }
  0xeb   : > { %v566_v53 = vmul.f32 %v1796_v47, %v1791_v34  ;;  %vm571_vm9 = vweird.f32 %v1796_v47  ;;  %v564_v10 = vsel %vm561_vm7, %v563_v2, %v559_v6 }
  0xec   : > { %1129 = vrcp.f32 %v1794_v41  ;;  %vm1817_vm10 = vmor %vm570_vm8, %vm571_vm9  ;;  %vm584_vm12 = vweird.f32 %v1794_v41  ;;  %v590_v31 = vand.u32 2147483648, %v1794_v41  ;;  %v588_v35 = vand.u32 2147483647, %v1794_v41 }
  0xed   : > { %v567_v30 = vsub.f32 1.0, %v566_v53  ;;  %v599_v53 = vld [vmem:[#allocation2 + $0x58] sm:$0xff] }
  0xee   : > { %v591_v39 = vor.u32 1.1754944e-38, %v590_v31  ;;  %vm589_vm15 = vcmp.eq.f32.partialorder %v588_v35, 8.507059e+37 }
  0xef   : > { %v568_v7 = vmul.f32 %v1796_v47, %v567_v30  ;;  %v603_v30 = vld [vmem:[#allocation2 + $0x8] sm:$0xff] }
  0xf1   : > { %v569_v15 = vadd.f32 %v1796_v47, %v568_v7 }
  0xf2   : > { %v1801_v48 = vpop.eup %1129 }
  0xf3   : > { %v580_v3 = vmul.f32 %v1801_v48, %v1794_v41  ;;  %v573_v25 = vsel %vm1817_vm10, %v1796_v47, %v569_v15  ;;  %vm585_vm13 = vweird.f32 %v1801_v48  ;;  %v597_v41 = vld [vmem:[#allocation2 + $0x30] sm:$0xff]  ;;  %v598_v47 = vld [vmem:[#allocation2] sm:$0xff] }
  0xf4   : > { %v398_v44 = vpop.f32.mrf.mxu0  ;;  %v578_v29 = vsel %vm575_vm11, %v577_v23, %v573_v25  ;;  %vm586_vm14 = vmor %vm584_vm12, %vm585_vm13  ;;  %v611_v23 = vld [vmem:[#allocation2 + $0x78] sm:$0xff] }
  0xf5   : > { %v427_v49 = vpop.f32.mrf.mxu1  ;;  %v581_v18 = vsub.f32 1.0, %v580_v3 }
  0xf6   : > { %v428_v50 = vadd.f32 %v427_v49, %v398_v44  ;;  %v456_v51 = vpop.f32.mrf.mxu2 }
  0xf7   : > { %v582_v26 = vmul.f32 %v1801_v48, %v581_v18 }
  0xf8   : > { %v457_v54 = vadd.f32 %v456_v51, %v428_v50 }
  0xf9   : > { %v485_v57 = vpop.f32.mrf.mxu3  ;;  %v583_v34 = vadd.f32 %v1801_v48, %v582_v26 }
  0xfa   : > { %v486_v58 = vadd.f32 %v485_v57, %v457_v54  ;;  %v600_v54 = vld [vmem:[#allocation2 + $0x18] sm:$0xff] }
  0xfb   : > { %v587_v42 = vsel %vm586_vm14, %v1801_v48, %v583_v34  ;;  %v604_v48 = vld [vmem:[#allocation2 + $0x48] sm:$0xff] }
  0xfc   : > { %v593_v62 = vmul.f32 %v550_v59, %v486_v58  ;;  %v401_v63 = vpop.f32.mrf.mxu0  ;;  %v592_v45 = vsel %vm589_vm15, %v591_v39, %v587_v42 }
  0xfd   : > { %v430_v0 = vpop.f32.mrf.mxu1 }
  0xfe   : > { %v431_v1 = vadd.f32 %v430_v0, %v401_v63  ;;  %629 = vmatmul.f32.vlgmr.msrb.gmra.mxu0 %v593_v62  ;;  %658 = vmatmul.f32.vlgmr.msrb.gmra.mxu1 %v593_v62  ;;  %v459_v4 = vpop.f32.mrf.mxu2  ;;  %v605_v0 = vld [vmem:[#allocation2 + $0x40] sm:$0xff] }
  0xff   : > { %687 = vmatmul.f32.vlgmr.msrb.gmra.mxu2 %v593_v62  ;;  %716 = vmatmul.f32.vlgmr.msrb.gmra.mxu3 %v593_v62 }
 0x100   : > { %v460_v5 = vadd.f32 %v459_v4, %v431_v1 }
 0x101   : > { %v488_v8 = vpop.f32.mrf.mxu3 }
 0x102   : > { %v489_v9 = vadd.f32 %v488_v8, %v460_v5 }
 0x104   : > { %v594_v13 = vmul.f32 %v564_v10, %v489_v9  ;;  %v404_v14 = vpop.f32.mrf.mxu0  ;;  %v607_v9 = vld [vmem:[#allocation2 + $0x10] sm:$0xff]  ;;  %v608_v10 = vld [vmem:[#allocation2 + $0x38] sm:$0xff] }
 0x105   : > { %v433_v19 = vpop.f32.mrf.mxu1 }
 0x106   : > { %v434_v21 = vadd.f32 %v433_v19, %v404_v14  ;;  %632 = vmatmul.f32.gmra.mxu0 %v594_v13  ;;  %661 = vmatmul.f32.gmra.mxu1 %v594_v13  ;;  %v462_v22 = vpop.f32.mrf.mxu2 }
 0x107   : > { %690 = vmatmul.f32.gmra.mxu2 %v594_v13  ;;  %719 = vmatmul.f32.gmra.mxu3 %v594_v13  ;;  %v610_v13 = vld [vmem:[#allocation2 + $0x70] sm:$0xff] }
 0x108   : > { %v463_v24 = vadd.f32 %v462_v22, %v434_v21 }
 0x109   : > { %v491_v27 = vpop.f32.mrf.mxu3 }
 0x10a   : > { %v492_v28 = vadd.f32 %v491_v27, %v463_v24  ;;  %v612_v24 = vld [vmem:[#allocation2 + $0x28] sm:$0xff] }
 0x10c   : > { %v595_v32 = vmul.f32 %v578_v29, %v492_v28  ;;  %v407_v33 = vpop.f32.mrf.mxu0 }
 0x10d   : > { %v436_v36 = vpop.f32.mrf.mxu1 }
 0x10e   : > { %v437_v37 = vadd.f32 %v436_v36, %v407_v33  ;;  %635 = vmatmul.f32.gmra.mxu0 %v595_v32  ;;  %664 = vmatmul.f32.gmra.mxu1 %v595_v32  ;;  %v465_v38 = vpop.f32.mrf.mxu2 }
 0x10f   : > { %693 = vmatmul.f32.gmra.mxu2 %v595_v32  ;;  %722 = vmatmul.f32.gmra.mxu3 %v595_v32 }
 0x110   : > { %v466_v40 = vadd.f32 %v465_v38, %v437_v37 }
 0x111   : > { %v494_v43 = vpop.f32.mrf.mxu3 }
 0x112   : > { %v495_v44 = vadd.f32 %v494_v43, %v466_v40 }
 0x114   : > { %v596_v46 = vmul.f32 %v592_v45, %v495_v44 }
 0x116   : > { %638 = vmatmul.f32.gmra.mxu0 %v596_v46  ;;  %667 = vmatmul.f32.gmra.mxu1 %v596_v46 }
 0x117   : > { %696 = vmatmul.f32.gmra.mxu2 %v596_v46  ;;  %725 = vmatmul.f32.gmra.mxu3 %v596_v46 }
 0x17b   : > { %v630_v49 = vpop.f32.mrf.mxu0  ;;  %v659_v50 = vpop.f32.mrf.mxu1 }
 0x17c   : > { %v729_v51 = vadd.f32 %v630_v49, %v597_v41  ;;  %v730_v52 = vadd.f32 %v659_v50, %v598_v47 }
 0x17e   : > { %745 = vst [vmem:[#allocation2 + $0x30] sm:$0xff] %v729_v51 }
 0x17f   : > { %746 = vst [vmem:[#allocation2] sm:$0xff] %v730_v52 }
 0x182   : > { %v688_v57 = vpop.f32.mrf.mxu2  ;;  %v717_v58 = vpop.f32.mrf.mxu3 }
 0x183   : > { %v731_v59 = vadd.f32 %v688_v57, %v599_v53  ;;  %v732_v60 = vadd.f32 %v717_v58, %v600_v54  ;;  %v633_v61 = vpop.f32.mrf.mxu0  ;;  %v662_v62 = vpop.f32.mrf.mxu1 }
 0x184   : > { %v733_v63 = vadd.f32 %v633_v61, %v601_v55  ;;  %v734_v16 = vadd.f32 %v662_v62, %v602_v56 }
 0x185   : > { %747 = vst [vmem:[#allocation2 + $0x58] sm:$0xff] %v731_v59 }
 0x186   : > { %748 = vst [vmem:[#allocation2 + $0x18] sm:$0xff] %v732_v60 }
 0x187   : > { %749 = vst [vmem:[#allocation2 + $0x50] sm:$0xff] %v733_v63 }
 0x188   : > { %750 = vst [vmem:[#allocation2 + $0x68] sm:$0xff] %v734_v16 }
 0x18a   : > { %v691_v1 = vpop.f32.mrf.mxu2  ;;  %v720_v4 = vpop.f32.mrf.mxu3 }
 0x18b   : > { %v735_v2 = vadd.f32 %v691_v1, %v603_v30  ;;  %v736_v3 = vadd.f32 %v720_v4, %v604_v48  ;;  %v636_v5 = vpop.f32.mrf.mxu0  ;;  %v665_v6 = vpop.f32.mrf.mxu1 }
 0x18c   : > { %v737_v7 = vadd.f32 %v636_v5, %v605_v0  ;;  %v738_v8 = vadd.f32 %v665_v6, %v606_v12 }
 0x18d   : > { %751 = vst [vmem:[#allocation2 + $0x8] sm:$0xff] %v735_v2 }
 0x18e   : > { %752 = vst [vmem:[#allocation2 + $0x48] sm:$0xff] %v736_v3 }
 0x18f   : > { %753 = vst [vmem:[#allocation2 + $0x40] sm:$0xff] %v737_v7 }
 0x190   : > { %754 = vst [vmem:[#allocation2 + $0x20] sm:$0xff] %v738_v8 }
 0x192   : > { %v694_v14 = vpop.f32.mrf.mxu2  ;;  %v723_v15 = vpop.f32.mrf.mxu3 }
 0x193   : > { %v739_v17 = vadd.f32 %v694_v14, %v607_v9  ;;  %v740_v18 = vadd.f32 %v723_v15, %v608_v10  ;;  %v639_v19 = vpop.f32.mrf.mxu0  ;;  %v668_v20 = vpop.f32.mrf.mxu1 }
 0x194   : > { %v741_v21 = vadd.f32 %v639_v19, %v609_v11  ;;  %v742_v22 = vadd.f32 %v668_v20, %v610_v13 }
 0x195   : > { %755 = vst [vmem:[#allocation2 + $0x10] sm:$0xff] %v739_v17 }
 0x196   : > { %756 = vst [vmem:[#allocation2 + $0x38] sm:$0xff] %v740_v18 }
 0x197   : > { %757 = vst [vmem:[#allocation2 + $0x60] sm:$0xff] %v741_v21 }
 0x198   : > { %758 = vst [vmem:[#allocation2 + $0x70] sm:$0xff] %v742_v22 }
 0x19a   : > { %v697_v25 = vpop.f32.mrf.mxu2  ;;  %v726_v26 = vpop.f32.mrf.mxu3  ;;  %764 = sbr.rel (%p1029_p5) target bundleno = 586 (0x24a), region = 60 }
 0x19b   : > { %v743_v27 = vadd.f32 %v697_v25, %v611_v23  ;;  %v744_v28 = vadd.f32 %v726_v26, %v612_v24 }
 0x19d   : > { %759 = vst [vmem:[#allocation2 + $0x78] sm:$0xff] %v743_v27 }
 0x19e   : > { %760 = vst [vmem:[#allocation2 + $0x28] sm:$0xff] %v744_v28 }
 0x19f   : > { %v779_v32 = vld [vmem:[#allocation2 + $0x10] sm:$0xff]  ;;  %v780_v33 = vld [vmem:[#allocation2 + $0x38] sm:$0xff]  ;;  %v775_v34 = vld [vmem:[#allocation2 + $0x8] sm:$0xff]  ;;  %vm785_vm0 = vcmask 261120  }
 0x1a0   : > { %v776_v35 = vld [vmem:[#allocation2 + $0x48] sm:$0xff]  ;;  %v781_v36 = vld [vmem:[#allocation2 + $0x60] sm:$0xff]  ;;  %v782_v37 = vld [vmem:[#allocation2 + $0x70] sm:$0xff] }
 0x1a1   : > { %v777_v38 = vld [vmem:[#allocation2 + $0x40] sm:$0xff]  ;;  %810 = vmatpush.msra.mxu0 %v781_v36  ;;  %839 = vmatpush.msra.mxu1 %v782_v37  ;;  %v771_v39 = vld [vmem:[#allocation2 + $0x58] sm:$0xff]  ;;  %v773_v44 = vld [vmem:[#allocation2 + $0x50] sm:$0xff] }
 0x1a2   : > { %v772_v40 = vld [vmem:[#allocation2 + $0x18] sm:$0xff]  ;;  %v778_v42 = vld [vmem:[#allocation2 + $0x20] sm:$0xff]  ;;  %v774_v45 = vld [vmem:[#allocation2 + $0x68] sm:$0xff] }
 0x1a3   : > { %v765_v43 = vld [vmem:[%s1879_s2] sm:$0xff]  ;;  %811 = vmatpush.msra.mxu0 %v777_v38  ;;  %840 = vmatpush.msra.mxu1 %v778_v42  ;;  %v769_v46 = vld [vmem:[#allocation2 + $0x30] sm:$0xff]  ;;  %v766_v47 = vld [vmem:[%s1879_s2 + $0x8] sm:$0xff] }
 0x1a4   : > { %v783_v29 = vld [vmem:[#allocation2 + $0x78] sm:$0xff]  ;;  %v770_v41 = vld [vmem:[#allocation2] sm:$0xff]  ;;  %v767_v49 = vld [vmem:[%s1879_s2 + $0x10] sm:$0xff] }
 0x1a5   : > { %v784_v31 = vld [vmem:[#allocation2 + $0x28] sm:$0xff]  ;;  %868 = vmatpush.msra.mxu2 %v783_v29  ;;  %812 = vmatpush.msra.mxu0 %v773_v44  ;;  %v768_v50 = vld [vmem:[%s1879_s2 + $0x18] sm:$0xff] }
 0x1a6   : > { %897 = vmatpush.msra.mxu3 %v784_v31  ;;  %841 = vmatpush.msra.mxu1 %v774_v45 }
 0x1a7   : > { %869 = vmatpush.msra.mxu2 %v779_v32  ;;  %813 = vmatpush.msra.mxu0 %v769_v46 }
 0x1a8   : > { %898 = vmatpush.msra.mxu3 %v780_v33  ;;  %842 = vmatpush.msra.mxu1 %v770_v41 }
 0x1a9   : > { %870 = vmatpush.msra.mxu2 %v775_v34  ;;  %1030 = vmatmul.msk.f32.vlgmr.msra.gmra.mxu0 %vm785_vm0, %v765_v43 }
 0x1aa   : > { %899 = vmatpush.msra.mxu3 %v776_v35  ;;  %1034 = vmatmul.msk.f32.vlgmr.msra.gmra.mxu1 %vm785_vm0, %v765_v43 }
 0x1ab   : > { %871 = vmatpush.msra.mxu2 %v771_v39 }
 0x1ac   : > { %900 = vmatpush.msra.mxu3 %v772_v40  ;;  %1038 = vmatmul.msk.f32.vlgmr.msra.gmra.mxu2 %vm785_vm0, %v765_v43 }
 0x1ad   : > { %1042 = vmatmul.msk.f32.vlgmr.msra.gmra.mxu3 %vm785_vm0, %v765_v43 }
 0x1b1   : > { %1031 = vmatmul.msk.f32.gmra.mxu0 %vm785_vm0, %v766_v47 }
 0x1b2   : > { %1035 = vmatmul.msk.f32.gmra.mxu1 %vm785_vm0, %v766_v47 }
 0x1b4   : > { %1039 = vmatmul.msk.f32.gmra.mxu2 %vm785_vm0, %v766_v47 }
 0x1b5   : > { %1043 = vmatmul.msk.f32.gmra.mxu3 %vm785_vm0, %v766_v47 }
 0x1b9   : > { %1032 = vmatmul.msk.f32.gmra.mxu0 %vm785_vm0, %v767_v49 }
 0x1ba   : > { %1036 = vmatmul.msk.f32.gmra.mxu1 %vm785_vm0, %v767_v49 }
 0x1bc   : > { %1040 = vmatmul.msk.f32.gmra.mxu2 %vm785_vm0, %v767_v49 }
 0x1bd   : > { %1044 = vmatmul.msk.f32.gmra.mxu3 %vm785_vm0, %v767_v49 }
 0x1c1   : > { %1033 = vmatmul.msk.f32.gmra.mxu0 %vm785_vm0, %v768_v50 }
 0x1c2   : > { %1037 = vmatmul.msk.f32.gmra.mxu1 %vm785_vm0, %v768_v50 }
 0x1c4   : > { %1041 = vmatmul.msk.f32.gmra.mxu2 %vm785_vm0, %v768_v50 }
 0x1c5   : > { %1045 = vmatmul.msk.f32.gmra.mxu3 %vm785_vm0, %v768_v50 }
 0x226   : > { %v815_v51 = vpop.f32.mrf.mxu0 }
 0x227   : > { %v844_v52 = vpop.f32.mrf.mxu1  ;;  %914 = vst [vmem:[#allocation9] sm:$0xff] %v815_v51 }
 0x228   : > { %915 = vst [vmem:[#allocation9 + $0x8] sm:$0xff] %v844_v52 }
 0x22e   : > { %v818_v55 = vpop.f32.mrf.mxu0 }
 0x22f   : > { %v873_v53 = vpop.f32.mrf.mxu2  ;;  %v847_v56 = vpop.f32.mrf.mxu1  ;;  %918 = vst [vmem:[#allocation9 + $0x20] sm:$0xff] %v818_v55 }
 0x230   : > { %v902_v54 = vpop.f32.mrf.mxu3  ;;  %916 = vst [vmem:[#allocation9 + $0x10] sm:$0xff] %v873_v53 }
 0x231   : > { %917 = vst [vmem:[#allocation9 + $0x18] sm:$0xff] %v902_v54 }
 0x232   : > { %919 = vst [vmem:[#allocation9 + $0x28] sm:$0xff] %v847_v56 }
 0x236   : > { %v821_v59 = vpop.f32.mrf.mxu0 }
 0x237   : > { %v876_v57 = vpop.f32.mrf.mxu2  ;;  %v850_v60 = vpop.f32.mrf.mxu1  ;;  %922 = vst [vmem:[#allocation9 + $0x40] sm:$0xff] %v821_v59 }
 0x238   : > { %v905_v58 = vpop.f32.mrf.mxu3  ;;  %920 = vst [vmem:[#allocation9 + $0x30] sm:$0xff] %v876_v57 }
 0x239   : > { %921 = vst [vmem:[#allocation9 + $0x38] sm:$0xff] %v905_v58 }
 0x23a   : > { %923 = vst [vmem:[#allocation9 + $0x48] sm:$0xff] %v850_v60 }
 0x23e   : > { %v824_v63 = vpop.f32.mrf.mxu0 }
 0x23f   : > { %v879_v61 = vpop.f32.mrf.mxu2  ;;  %v853_v16 = vpop.f32.mrf.mxu1  ;;  %926 = vst [vmem:[#allocation9 + $0x60] sm:$0xff] %v824_v63 }
 0x240   : > { %v908_v62 = vpop.f32.mrf.mxu3  ;;  %924 = vst [vmem:[#allocation9 + $0x50] sm:$0xff] %v879_v61 }
 0x241   : > { %925 = vst [vmem:[#allocation9 + $0x58] sm:$0xff] %v908_v62 }
 0x242   : > { %927 = vst [vmem:[#allocation9 + $0x68] sm:$0xff] %v853_v16 }
 0x247   : > { %v882_v30 = vpop.f32.mrf.mxu2 }
 0x248   : > { %v911_v48 = vpop.f32.mrf.mxu3  ;;  %928 = vst [vmem:[#allocation9 + $0x70] sm:$0xff] %v882_v30 }
 0x249   : > { %929 = vst [vmem:[#allocation9 + $0x78] sm:$0xff] %v911_v48 }
 0x24a PF: > { %p1076_p7 = scmp.eq.s32.totalorder %s1395_s30, 3  ;;  %s1300_s13 = smov [#allocation9]  }
 0x24b   : > { %s935_s15 = sshll.u32 %s1300_s13, 4  ;;  %s937_s12 = sshll.u32 %s1882_s5, 4  ;;  %s936_s15 = int_to_ptr.vmem [resolvable:$true] %s935_s15  ;;  %s938_s12 = int_to_ptr.hbm [resolvable:$true] %s937_s12 }
 0x24c   : > { %s1301_s6 = smov 512   ;;  %s1302_s7 = smov 32  }
 0x24d   : > { %1059 = dma.vmem_to_hbm [thread:$0]  (%p1076_p7), %s936_s15, 2048, %s938_s12, [#allocation5], %s1301_s6, %s1301_s6, %s1302_s7  }
 0x24e   : > { %1274 = dma.done.wait (%p1076_p7), [#allocation5], 2048  }
 0x24f   : > { %1276 = vsyncadd (%p1076_p7), [#allocation5], 4294965248 }
 0x250 PF: > { %p17_p1 = scmp.ge.s32.totalorder %s1354_s22, 6   ;;  %s1908_s18 = smov %s1283_s19 }
 0x251   : > { %s1909_s19 = smov %s1287_s20  ;;  %s1910_s20 = smov %s1363_s25 }
 0x252   : > { %s1911_s21 = smov %s1354_s22  ;;  %19 = sbr.rel (!%p17_p1) target bundleno = 5 (0x5), region = 101 }
 0x257   :  { %954 = vsyncpa [#allocation4], 1 }
 0x258   :  { %956 = vsyncpa [#allocation4 + $0x1], 1 }
 0x259   :  { %957 = vsyncpa [#allocation7], 1 }
 0x25a   :  { %959 = vsyncpa [#allocation7 + $0x1], 1 }
 0x25b   :  { %960 = vsyncpa [#allocation5], 1 }
 0x25c   :  { %962 = vsyncpa [#allocation5 + $0x1], 1 }

</bundles_post_ra>
